<compile_context>
chip_gen: v6e
topology: v6e:2x2x1
jax: 0.10.0
libtpu: 0.0.40
codegen_flags: <defaults>
</compile_context>

<pallas_src>
import functools

import jax
import jax.numpy as jnp
from jax import lax
from jax.experimental import pallas as pl
from jax.experimental.pallas import tpu as pltpu

HEAD_PAD = 128  # lane-dense padded width of the fused (pi | v) head output


def actor_critic_kernel(state_ref, w1_ref, b1_ref, w2_ref, b2_ref,
                        wh_ref, bh_ref, out_ref, *, n_actions):
    x = state_ref[...]                                             # (TB, D)

    # fc1 + relu
    h1 = jnp.dot(x, w1_ref[...], preferred_element_type=jnp.float32) + b1_ref[...]
    h1 = jnp.maximum(h1, 0.0)                                      # (TB, fc1)

    # fc2 + relu
    h2 = jnp.dot(h1, w2_ref[...], preferred_element_type=jnp.float32) + b2_ref[...]
    h2 = jnp.maximum(h2, 0.0)                                      # (TB, fc2)

    # Fused actor+critic head: single MXU push, 128-lane output.
    head = jnp.dot(h2, wh_ref[...], preferred_element_type=jnp.float32) + bh_ref[...]

    col = lax.broadcasted_iota(jnp.int32, head.shape, 1)
    pi_mask = col < n_actions                                        # actor logits
    v_mask = jnp.logical_and(col >= n_actions, col < 2 * n_actions)  # critic out

    # Masked, numerically-stable softmax over the first n_actions columns only.
    masked = jnp.where(pi_mask, head, jnp.float32(-1e30))
    m = jnp.max(masked, axis=-1, keepdims=True)
    e = jnp.exp(masked - m)                    # padded / v columns underflow to 0
    denom = jnp.sum(e, axis=-1, keepdims=True)
    pi = e * pl.reciprocal(denom, approx=False)   # exact divide keeps 1e-4 check

    # Single lane-dense (TB, 128) output slab: [ pi | v | zeros ].
    # pi is already zero outside the actor columns (exp underflow), so a single
    # select for the critic columns suffices.
    out_ref[...] = pi + jnp.where(v_mask, head, 0.0)


@functools.partial(jax.jit, static_argnames=("tb",))
def actor_critic_forward(state, params, *, tb=8):
    """state: (B, input_dim) f32. params: dict of pre-transposed weights/biases."""
    B, in_dim = state.shape
    fc1 = params["w1"].shape[1]
    fc2 = params["w2"].shape[1]
    n_actions = params["wpi"].shape[1]
    assert 2 * n_actions <= HEAD_PAD

    # Fuse the pi/v head weights into one lane-padded (fc2, 128) matrix.
    w_head = jnp.zeros((fc2, HEAD_PAD), jnp.float32)
    w_head = w_head.at[:, :n_actions].set(params["wpi"])
    w_head = w_head.at[:, n_actions:2 * n_actions].set(params["wv"])
    b_head = jnp.zeros((1, HEAD_PAD), jnp.float32)
    b_head = b_head.at[:, :n_actions].set(params["bpi"])
    b_head = b_head.at[:, n_actions:2 * n_actions].set(params["bv"])

    # Pad batch up to a multiple of the batch tile (sublane multiple of 8).
    n_tiles = pl.cdiv(B, tb)
    bp = n_tiles * tb
    state_p = jnp.pad(state, ((0, bp - B), (0, 0))) if bp != B else state

    vmem = pltpu.MemorySpace.VMEM
    grid_spec = pltpu.PrefetchScalarGridSpec(
        num_scalar_prefetch=0,
        grid=(n_tiles,),
        in_specs=[
            # state tiles walk the batch axis; weights/biases stay resident
            # in VMEM across grid steps (constant block index).
            pl.BlockSpec((tb, in_dim), lambda i: (i, 0), memory_space=vmem),
            pl.BlockSpec((in_dim, fc1), lambda i: (0, 0), memory_space=vmem),
            pl.BlockSpec((1, fc1), lambda i: (0, 0), memory_space=vmem),
            pl.BlockSpec((fc1, fc2), lambda i: (0, 0), memory_space=vmem),
            pl.BlockSpec((1, fc2), lambda i: (0, 0), memory_space=vmem),
            pl.BlockSpec((fc2, HEAD_PAD), lambda i: (0, 0), memory_space=vmem),
            pl.BlockSpec((1, HEAD_PAD), lambda i: (0, 0), memory_space=vmem),
        ],
        out_specs=pl.BlockSpec((tb, HEAD_PAD), lambda i: (i, 0),
                               memory_space=vmem),
    )

    out = pl.pallas_call(
        functools.partial(actor_critic_kernel, n_actions=n_actions),
        out_shape=jax.ShapeDtypeStruct((bp, HEAD_PAD), jnp.float32),
        grid_spec=grid_spec,
        compiler_params=pltpu.CompilerParams(
            # Batch tiles are independent -> shard across TCs on v7x; no-op
            # (but harmless) on single-TC v5e/v6e.
            dimension_semantics=("parallel",),
        ),
    )(state_p, params["w1"], params["b1"], params["w2"], params["b2"],
      w_head, b_head)

    pi = out[:B, :n_actions]
    v = out[:B, n_actions:2 * n_actions]
    return pi, v


def init_params(key, input_dim, fc1_dims, fc2_dims, n_actions):
    """Deterministic synthetic init. Weights stored as (in, out) — i.e. W.T of
    PyTorch's nn.Linear layout. Biases stored as (1, out) for 2-D VMEM refs."""
    ks = jax.random.split(key, 8)

    def lin(kw, kb, fan_in, fan_out):
        bound = 1.0 / jnp.sqrt(jnp.float32(fan_in))
        w = jax.random.uniform(kw, (fan_in, fan_out), jnp.float32, -bound, bound)
        b = jax.random.uniform(kb, (1, fan_out), jnp.float32, -bound, bound)
        return w, b

    w1, b1 = lin(ks[0], ks[1], input_dim, fc1_dims)
    w2, b2 = lin(ks[2], ks[3], fc1_dims, fc2_dims)
    wpi, bpi = lin(ks[4], ks[5], fc2_dims, n_actions)
    wv, bv = lin(ks[6], ks[7], fc2_dims, n_actions)
    return {"w1": w1, "b1": b1, "w2": w2, "b2": b2,
            "wpi": wpi, "bpi": bpi, "wv": wv, "bv": bv}


def reference_forward(state, params):
    hp = lax.Precision.HIGHEST
    h1 = jnp.maximum(jnp.dot(state, params["w1"], precision=hp) + params["b1"], 0.0)
    h2 = jnp.maximum(jnp.dot(h1, params["w2"], precision=hp) + params["b2"], 0.0)
    logits = jnp.dot(h2, params["wpi"], precision=hp) + params["bpi"]
    pi = jax.nn.softmax(logits, axis=-1)
    v = jnp.dot(h2, params["wv"], precision=hp) + params["bv"]
    return pi, v


if __name__ == "__main__":
    # Shapes consistent with the module: input_dims=(16,), fc1=32, fc2=32,
    # n_actions=4; batch=16 with a batch tile of 8 -> grid=(2,).
    B, input_dim, fc1_dims, fc2_dims, n_actions = 16, 16, 32, 32, 4

    key = jax.random.PRNGKey(0)
    k_state, k_params = jax.random.split(key)

    state = jax.random.normal(k_state, (B, input_dim), jnp.float32)
    params = init_params(k_params, input_dim, fc1_dims, fc2_dims, n_actions)

    pi, v = actor_critic_forward(state, params, tb=8)
    jax.block_until_ready((pi, v))

    # Correctness check against a pure-JAX reference.
    pi_ref, v_ref = reference_forward(state, params)
    assert pi.shape == (B, n_actions) and v.shape == (B, n_actions)
    assert jnp.allclose(pi, pi_ref, atol=1e-4, rtol=1e-4)
    assert jnp.allclose(v, v_ref, atol=1e-4, rtol=1e-4)
    assert jnp.allclose(jnp.sum(pi, axis=-1), 1.0, atol=1e-4)

    print("KERNEL_OK")
</pallas_src>

<mosaic_0001>
module attributes {stable_mosaic.version = 11 : i64} {
  func.func @actor_critic_kernel(%arg0: i32, %arg1: memref<8x16xf32, #tpu.memory_space<vmem>>, %arg2: memref<16x32xf32, #tpu.memory_space<vmem>>, %arg3: memref<1x32xf32, #tpu.memory_space<vmem>>, %arg4: memref<32x32xf32, #tpu.memory_space<vmem>>, %arg5: memref<1x32xf32, #tpu.memory_space<vmem>>, %arg6: memref<32x128xf32, #tpu.memory_space<vmem>>, %arg7: memref<1x128xf32, #tpu.memory_space<vmem>>, %arg8: memref<8x128xf32, #tpu.memory_space<vmem>>) attributes {dimension_semantics = [#tpu.dimension_semantics<parallel>], iteration_bounds = array<i64: 2>, scalar_prefetch = 0 : i64, scratch_operands = 0 : i64, tpu.core_type = #tpu.core_type<tc>, window_params = [{transform_indices = @transform_0, window_bounds = array<i64: 8, 16>}, {pipeline_mode = #tpu.pipeline_mode<synchronous>, transform_indices = @transform_1, window_bounds = array<i64: 16, 32>}, {pipeline_mode = #tpu.pipeline_mode<synchronous>, transform_indices = @transform_2, window_bounds = array<i64: 1, 32>}, {pipeline_mode = #tpu.pipeline_mode<synchronous>, transform_indices = @transform_3, window_bounds = array<i64: 32, 32>}, {pipeline_mode = #tpu.pipeline_mode<synchronous>, transform_indices = @transform_4, window_bounds = array<i64: 1, 32>}, {pipeline_mode = #tpu.pipeline_mode<synchronous>, transform_indices = @transform_5, window_bounds = array<i64: 32, 128>}, {pipeline_mode = #tpu.pipeline_mode<synchronous>, transform_indices = @transform_6, window_bounds = array<i64: 1, 128>}, {transform_indices = @transform_7, window_bounds = array<i64: 8, 128>}]} {
    %c0 = arith.constant 0 : index
    %c0_0 = arith.constant 0 : index
    %0 = vector.load %arg1[%c0, %c0_0] : memref<8x16xf32, #tpu.memory_space<vmem>>, vector<8x16xf32>
    %c0_1 = arith.constant 0 : index
    %c0_2 = arith.constant 0 : index
    %1 = vector.load %arg2[%c0_1, %c0_2] : memref<16x32xf32, #tpu.memory_space<vmem>>, vector<16x32xf32>
    %cst = arith.constant dense<0.000000e+00> : vector<8x32xf32>
    %2 = tpu.matmul %0, %1, %cst {dimension_numbers = #tpu.dot_dimension_numbers<[1], [0], [0], [1], [0, 0, 1, 1], [], []>} : vector<8x16xf32>, vector<16x32xf32>, vector<8x32xf32> -> vector<8x32xf32>
    %c0_3 = arith.constant 0 : index
    %c0_4 = arith.constant 0 : index
    %3 = vector.load %arg3[%c0_3, %c0_4] : memref<1x32xf32, #tpu.memory_space<vmem>>, vector<1x32xf32>
    %4 = vector.broadcast %3 : vector<1x32xf32> to vector<8x32xf32>
    %5 = arith.addf %2, %4 : vector<8x32xf32>
    %cst_5 = arith.constant 0.000000e+00 : f32
    %6 = vector.broadcast %cst_5 : f32 to vector<8x32xf32>
    %7 = arith.maximumf %5, %6 : vector<8x32xf32>
    %c0_6 = arith.constant 0 : index
    %c0_7 = arith.constant 0 : index
    %8 = vector.load %arg4[%c0_6, %c0_7] : memref<32x32xf32, #tpu.memory_space<vmem>>, vector<32x32xf32>
    %cst_8 = arith.constant dense<0.000000e+00> : vector<8x32xf32>
    %9 = tpu.matmul %7, %8, %cst_8 {dimension_numbers = #tpu.dot_dimension_numbers<[1], [0], [0], [1], [0, 0, 1, 1], [], []>} : vector<8x32xf32>, vector<32x32xf32>, vector<8x32xf32> -> vector<8x32xf32>
    %c0_9 = arith.constant 0 : index
    %c0_10 = arith.constant 0 : index
    %10 = vector.load %arg5[%c0_9, %c0_10] : memref<1x32xf32, #tpu.memory_space<vmem>>, vector<1x32xf32>
    %11 = vector.broadcast %10 : vector<1x32xf32> to vector<8x32xf32>
    %12 = arith.addf %9, %11 : vector<8x32xf32>
    %cst_11 = arith.constant 0.000000e+00 : f32
    %13 = vector.broadcast %cst_11 : f32 to vector<8x32xf32>
    %14 = arith.maximumf %12, %13 : vector<8x32xf32>
    %c0_12 = arith.constant 0 : index
    %c0_13 = arith.constant 0 : index
    %15 = vector.load %arg6[%c0_12, %c0_13] : memref<32x128xf32, #tpu.memory_space<vmem>>, vector<32x128xf32>
    %cst_14 = arith.constant dense<0.000000e+00> : vector<8x128xf32>
    %16 = tpu.matmul %14, %15, %cst_14 {dimension_numbers = #tpu.dot_dimension_numbers<[1], [0], [0], [1], [0, 0, 1, 1], [], []>} : vector<8x32xf32>, vector<32x128xf32>, vector<8x128xf32> -> vector<8x128xf32>
    %c0_15 = arith.constant 0 : index
    %c0_16 = arith.constant 0 : index
    %17 = vector.load %arg7[%c0_15, %c0_16] : memref<1x128xf32, #tpu.memory_space<vmem>>, vector<1x128xf32>
    %18 = vector.broadcast %17 : vector<1x128xf32> to vector<8x128xf32>
    %19 = arith.addf %16, %18 : vector<8x128xf32>
    %20 = tpu.iota {dimensions = array<i32: 1>} : vector<8x128xi32>
    %c4_i32 = arith.constant 4 : i32
    %21 = vector.broadcast %c4_i32 : i32 to vector<8x128xi32>
    %22 = arith.cmpi slt, %20, %21 : vector<8x128xi32>
    %c4_i32_17 = arith.constant 4 : i32
    %23 = vector.broadcast %c4_i32_17 : i32 to vector<8x128xi32>
    %24 = arith.cmpi sge, %20, %23 : vector<8x128xi32>
    %c8_i32 = arith.constant 8 : i32
    %25 = vector.broadcast %c8_i32 : i32 to vector<8x128xi32>
    %26 = arith.cmpi slt, %20, %25 : vector<8x128xi32>
    %27 = arith.andi %24, %26 : vector<8x128xi1>
    %cst_18 = arith.constant -1.000000e+30 : f32
    %28 = vector.broadcast %cst_18 : f32 to vector<8x128xf32>
    %29 = arith.select %22, %19, %28 : vector<8x128xi1>, vector<8x128xf32>
    %cst_19 = arith.constant dense<0xFF800000> : vector<8xf32>
    %30 = vector.multi_reduction <maximumf>, %29, %cst_19 [1] : vector<8x128xf32> to vector<8xf32>
    %31 = vector.shape_cast %30 : vector<8xf32> to vector<8x1xf32>
    %32 = vector.broadcast %31 : vector<8x1xf32> to vector<8x128xf32>
    %33 = arith.subf %29, %32 : vector<8x128xf32>
    %34 = math.exp %33 : vector<8x128xf32>
    %cst_20 = arith.constant dense<0.000000e+00> : vector<8xf32>
    %35 = vector.multi_reduction <add>, %34, %cst_20 [1] : vector<8x128xf32> to vector<8xf32>
    %36 = vector.shape_cast %35 : vector<8xf32> to vector<8x1xf32>
    %37 = tpu.reciprocal %36 : vector<8x1xf32> -> vector<8x1xf32>
    %38 = vector.broadcast %37 : vector<8x1xf32> to vector<8x128xf32>
    %39 = arith.mulf %34, %38 : vector<8x128xf32>
    %cst_21 = arith.constant 0.000000e+00 : f32
    %40 = vector.broadcast %cst_21 : f32 to vector<8x128xf32>
    %41 = arith.select %27, %19, %40 : vector<8x128xi1>, vector<8x128xf32>
    %42 = arith.addf %39, %41 : vector<8x128xf32>
    %c0_22 = arith.constant 0 : index
    %c0_23 = arith.constant 0 : index
    %43 = vector.load %arg8[%c0_22, %c0_23] : memref<8x128xf32, #tpu.memory_space<vmem>>, vector<8x128xf32>
    tpu.vector_store %arg8[%c0_22, %c0_23], %42 {strides = array<i32>} : memref<8x128xf32, #tpu.memory_space<vmem>>, vector<8x128xf32>,
    return
  }
  func.func @transform_0(%arg0: i32) -> (i32, i32) {
    %c0_i32 = arith.constant 0 : i32
    %c0_i32_0 = arith.constant 0 : i32
    return %arg0, %c0_i32 : i32, i32
  }
  func.func @transform_1(%arg0: i32) -> (i32, i32) {
    %c0_i32 = arith.constant 0 : i32
    %c0_i32_0 = arith.constant 0 : i32
    %c0_i32_1 = arith.constant 0 : i32
    return %c0_i32, %c0_i32_0 : i32, i32
  }
  func.func @transform_2(%arg0: i32) -> (i32, i32) {
    %c0_i32 = arith.constant 0 : i32
    %c0_i32_0 = arith.constant 0 : i32
    %c0_i32_1 = arith.constant 0 : i32
    return %c0_i32, %c0_i32_0 : i32, i32
  }
  func.func @transform_3(%arg0: i32) -> (i32, i32) {
    %c0_i32 = arith.constant 0 : i32
    %c0_i32_0 = arith.constant 0 : i32
    %c0_i32_1 = arith.constant 0 : i32
    return %c0_i32, %c0_i32_0 : i32, i32
  }
  func.func @transform_4(%arg0: i32) -> (i32, i32) {
    %c0_i32 = arith.constant 0 : i32
    %c0_i32_0 = arith.constant 0 : i32
    %c0_i32_1 = arith.constant 0 : i32
    return %c0_i32, %c0_i32_0 : i32, i32
  }
  func.func @transform_5(%arg0: i32) -> (i32, i32) {
    %c0_i32 = arith.constant 0 : i32
    %c0_i32_0 = arith.constant 0 : i32
    %c0_i32_1 = arith.constant 0 : i32
    return %c0_i32, %c0_i32_0 : i32, i32
  }
  func.func @transform_6(%arg0: i32) -> (i32, i32) {
    %c0_i32 = arith.constant 0 : i32
    %c0_i32_0 = arith.constant 0 : i32
    %c0_i32_1 = arith.constant 0 : i32
    return %c0_i32, %c0_i32_0 : i32, i32
  }
  func.func @transform_7(%arg0: i32) -> (i32, i32) {
    %c0_i32 = arith.constant 0 : i32
    %c0_i32_0 = arith.constant 0 : i32
    return %arg0, %c0_i32 : i32, i32
  }
}

</mosaic_0001>

<bundles_post_ra>
// kernel: actor_critic_forward.1
= control target key start
LH: loop header
LB: loop body
LE: loop exit
PB: predicated region body
PF: predicated region fallthrough
CT: control target
= control target key end

     0   :  { %s722_s24 = smov 0   ;;  %s796_s0 = inlined_call_operand.vmem [shape: f32[16,16], index: 0, kind: input, shape index: {}]   ;;  %s797_s1 = inlined_call_operand.vmem [shape: f32[16,32], index: 1, kind: input, shape index: {}]   ;;  %s798_s2 = inlined_call_operand.vmem [shape: f32[1,32], index: 2, kind: input, shape index: {}]   ;;  %s799_s3 = inlined_call_operand.vmem [shape: f32[32,32], index: 3, kind: input, shape index: {}]   ;;  %s800_s4 = inlined_call_operand.vmem [shape: f32[1,32], index: 4, kind: input, shape index: {}]   ;;  %s801_s5 = inlined_call_operand.vmem [shape: f32[32,128], index: 5, kind: input, shape index: {}]   ;;  %s802_s6 = inlined_call_operand.vmem [shape: f32[1,128], index: 6, kind: input, shape index: {}]   ;;  %s803_s7 = inlined_call_operand.vmem [shape: f32[16,128], index: 7, kind: output, shape index: {}]  }
   0x1 LB: > { %s601_s25 = sadd.s32 4294967295, %s678_s24   ;;  %p605_p0 = scmp.ge.s32.totalorder %s678_s24, 1  ;;  %s678_s24 = sphi %s722_s24, %s17_s24  }
   0x2   : > { %p236_p1 = scmp.lt.s32.totalorder %s678_s24, 3 }
   0x4   : > { %p237_p2 = pnand %p605_p0, %p236_p1 }
   0x5   : > { %p266_p3 = scmp.lt.s32.totalorder (!%p237_p2), %s601_s25, 1 }
   0x6   : > { %240 = sbr.rel (%p237_p2) target bundleno = 920 (0x398), region = 48 }
   0xb   : > { %v276_v0 = vld [vmem:[%s797_s1 + $0x8] sm:$0xff]  ;;  %v680_v1 = vmov 0.0   ;;  %v275_v2 = vld [vmem:[%s797_s1] sm:$0xff]  ;;  %vm681_vm0 = vmmov 0   ;;  %v362_v3 = vld [vmem:[%s799_s3 + $0x18] sm:$0xff]  ;;  %s807_s25 = smov (!%p266_p3, %s601_s25), 1  ;;  %v529_v22 = vlaneseq }
   0xc   : > { %629 = vmatprep.subr.mxu0 %v680_v1  ;;  %633 = vmatprep.mubr.msk.f32.mxu0 %vm681_vm0, %v680_v1  ;;  %s606_s9 = sshll.u32 %s807_s25, 3  ;;  %vm284_vm1 = vcmask 130048   ;;  %v361_v5 = vld [vmem:[%s799_s3 + $0x10] sm:$0xff]  ;;  %v360_v6 = vld [vmem:[%s799_s3 + $0x8] sm:$0xff]  ;;  %v359_v7 = vld [vmem:[%s799_s3] sm:$0xff]  ;;  %vm370_vm2 = vcmask 261120  }
   0xd   : > { %630 = vmatpush3.msra.mxu0 %v276_v0  ;;  %636 = vmatprep.subr.mxu1 %v680_v1  ;;  %s269_s12 = scalar_lea.vmem %s796_s0, %s606_s9  ;;  %v448_v8 = vld [vmem:[%s801_s5 + $0x18] sm:$0xff]  ;;  %v608_v9 = vld [vmem:[%s798_s2] ss:$0 sm:$0xff]  ;;  %v447_v14 = vld [vmem:[%s801_s5 + $0x10] sm:$0xff]  ;;  %v530_v23 = vand.u32 127, %v529_v22  ;;  %s273_s15 = scalar_lea.vmem %s803_s7, %s606_s9 }
   0xe   : > { %631 = vmatprep.subr.mxu0 %v680_v1  ;;  %637 = vmatpush3.msra.mxu1 %v362_v3  ;;  %v274_v4 = vld [vmem:[%s269_s12] sm:$0xff]  ;;  %v446_v15 = vld [vmem:[%s801_s5 + $0x8] sm:$0xff] }
   0xf   : > { %632 = vmatpush3.msra.mxu0 %v275_v2  ;;  %638 = vmatprep.subr.mxu1 %v680_v1  ;;  %v445_v16 = vld [vmem:[%s801_s5] sm:$0xff]  ;;  %vm532_vm3 = vcmp.ge.s32.totalorder %v530_v23, 4  ;;  %vm533_vm4 = vcmp.lt.s32.totalorder %v530_v23, 8  ;;  %vm531_vm6 = vcmp.lt.s32.totalorder %v530_v23, 4 }
  0x10   : > { %644 = vmatprep.mubr.msk.f32.mxu1 %vm681_vm0, %v680_v1  ;;  %647 = vmatprep.subr.mxu0 %v680_v1  ;;  %v610_v17 = vld [vmem:[%s800_s4] ss:$0 sm:$0xff]  ;;  %vm782_vm5 = vmand %vm532_vm3, %vm533_vm4 }
  0x11   : > { %634 = vmatmul.mubr.msk.f32.vlgmr.msra.gmra.mxu0 %vm284_vm1, %v274_v4  ;;  %639 = vmatpush3.msra.mxu1 %v361_v5  ;;  %v612_v24 = vld [vmem:[%s802_s6] ss:$0 sm:$0xff] }
  0x12   : > { %655 = vmatprep.mubr.msk.f32.mxu0 %vm681_vm0, %v680_v1  ;;  %640 = vmatprep.subr.mxu1 %v680_v1 }
  0x13   : > { %641 = vmatpush3.msra.mxu1 %v360_v6  ;;  %648 = vmatpush3.msra.mxu0 %v448_v8 }
  0x14   : > { %642 = vmatprep.subr.mxu1 %v680_v1  ;;  %649 = vmatprep.subr.mxu0 %v680_v1 }
  0x15   : > { %643 = vmatpush3.msra.mxu1 %v359_v7  ;;  %650 = vmatpush3.msra.mxu0 %v447_v14 }
  0x16   : > { %651 = vmatprep.subr.mxu0 %v680_v1 }
  0x17   : > { %652 = vmatpush3.msra.mxu0 %v446_v15 }
  0x18   : > { %653 = vmatprep.subr.mxu0 %v680_v1 }
  0x19   : > { %654 = vmatpush3.msra.mxu0 %v445_v16 }
  0xd1   : > { %v354_v10 = vpop.f32.mrf.mxu0 }
  0xd2   : > { %v355_v11 = vadd.f32 %v608_v9, %v354_v10 }
  0xd3   : > { %v635_v12 = vpop.f32.mrf.mxu0 }
  0xd4   : > { %v358_v13 = vmax.f32 %v355_v11, 0.0 }
  0xd6   : > { %645 = vmatmul.mubr.msk.f32.vlgmr.msra.gmra.mxu1 %vm370_vm2, %v358_v13 }
 0x196   : > { %v440_v18 = vpop.f32.mrf.mxu1 }
 0x197   : > { %v441_v19 = vadd.f32 %v610_v17, %v440_v18 }
 0x198   : > { %v646_v20 = vpop.f32.mrf.mxu1 }
 0x199   : > { %v444_v21 = vmax.f32 %v441_v19, 0.0 }
 0x19b   : > { %656 = vmatmul.mubr.msk.f32.vlgmr.msra.gmra.mxu0 %vm370_vm2, %v444_v21 }
 0x25b   : > { %v525_v25 = vpop.f32.mrf.mxu0 }
 0x25c   : > { %v526_v27 = vadd.f32 %v612_v24, %v525_v25 }
 0x25d   : > { %v657_v28 = vpop.f32.mrf.mxu0 }
 0x25e   : > { %v545_v29 = vsel %vm782_vm5, %v526_v27, 0.0  ;;  %v535_v30 = vsel %vm531_vm6, %v526_v27, -1e+30 }
 0x25f   : > { %536 = vmax.xlane.f32.xlu0 %v535_v30 }
 0x2e8   : > { %v537_v31 = vpop.xlane.xlu0 %536 }
 0x2e9   : > { %v538_v32 = vsub.f32 %v535_v30, %v537_v31 }
 0x2eb   : > { %v539_v33 = vmul.f32 1.442695, %v538_v32 }
 0x2ed   : > { %668 = vpow2.f32 %v539_v33 }
 0x2fa   : > { %v669_v34 = vpop.eup %668 }
 0x2fb   : > { %541 = vadd.xlane.f32.xlu0 %v669_v34 }
 0x384   : > { %v542_v35 = vpop.xlane.xlu0 %541 }
 0x385   : > { %670 = vrcp.f32 %v542_v35 }
 0x392   : > { %v671_v36 = vpop.eup %670 }
 0x393   : > { %v544_v37 = vmul.f32 %v671_v36, %v669_v34 }
 0x395   : > { %v546_v38 = vadd.f32 %v545_v29, %v544_v37 }
 0x397   : > { %547 = vst [vmem:[%s273_s15] sm:$0xff] %v546_v38 }
 0x398 PF: > { %s17_s24 = sadd.s32 1, %s678_s24  }
 0x399   : > { %p14_p4 = scmp.ge.s32.totalorder %s17_s24, 4  }
 0x39b   :  { %16 = sbr.rel (!%p14_p4) target bundleno = 1 (0x1), region = 78 }

</bundles_post_ra>
